<compile_context>
chip_gen: v7x
topology: tpu7x:2x2x1
jax: 0.10.0
libtpu: 0.0.40
codegen_flags: <defaults>
</compile_context>

<pallas_src>
import math

import jax
import jax.numpy as jnp
import numpy as np
from jax import lax
from jax.experimental import pallas as pl
from jax.experimental.pallas import tpu as pltpu

# ---- small, deterministic shapes consistent with the module ----
B, S = 2, 8
D_MODEL = 32
N_HEADS = 4
D_KV = 8
INNER = N_HEADS * D_KV          # 32
D_FF = 64
NUM_BUCKETS = 32
MAX_DISTANCE = 128
EPS = 1e-6

# ---- packed bf16 weight-slab layout (rows x 128 lanes) ----
ROW_QKV = 0                      # (D_MODEL, 3*INNER) in cols [0, 96)
ROW_WO = ROW_QKV + D_MODEL       # 32: (INNER, D_MODEL) in cols [0, 32)
ROW_WI = ROW_WO + INNER          # 64: (D_MODEL, D_FF) in cols [0, 64)
ROW_WFF = ROW_WI + D_MODEL       # 96: (D_FF, D_MODEL) in cols [0, 32)
SLAB_ROWS = ROW_WFF + D_FF       # 160
SLAB_COLS = 128


# ---------- static relative-position buckets (trace-time numpy; bidirectional) ----------
def _relative_position_bucket_np(q_len, k_len, num_buckets=NUM_BUCKETS,
                                 max_distance=MAX_DISTANCE):
    ctx = np.arange(q_len, dtype=np.int64)[:, None]
    mem = np.arange(k_len, dtype=np.int64)[None, :]
    rel = mem - ctx                                   # memory - query
    nb = num_buckets // 2
    rb = (rel > 0).astype(np.int64) * nb
    rp = np.abs(rel)
    max_exact = nb // 2
    is_small = rp < max_exact
    rp_f = np.maximum(rp.astype(np.float64), 1.0)     # avoid log(0); masked by is_small
    rp_large = max_exact + (np.log(rp_f / max_exact) /
                            math.log(max_distance / max_exact) *
                            (nb - max_exact)).astype(np.int64)
    rp_large = np.minimum(rp_large, nb - 1)
    return (rb + np.where(is_small, rp, rp_large)).astype(np.int32)


REL_BUCKETS = _relative_position_bucket_np(S, S)      # (S, S) int32, fully static


# ------------------------------ Pallas kernel ------------------------------
def t5_block_kernel(h_ref, pb_ref, w_ref, out_ref):
    x = h_ref[0]                                      # (S, D_MODEL) f32, one batch elem

    # ---- T5LayerNorm #1 (RMS, no mean/bias); ln1 scale folded into Wqkv ----
    var = jnp.mean(x * x, axis=-1, keepdims=True)
    xn = (x * lax.rsqrt(var + EPS)).astype(jnp.bfloat16)

    # ---- fused Q/K/V projection: one (S,32)@(32,128) MXU pass (cols>=96 are 0) ----
    wqkv = w_ref[ROW_QKV:ROW_QKV + D_MODEL, :]        # (32, 128) bf16
    qkv = jnp.dot(xn, wqkv, preferred_element_type=jnp.float32)
    qkv = qkv.astype(jnp.bfloat16)                    # (S, 128)

    wo_all = w_ref[ROW_WO:ROW_WO + INNER, :]          # (32, 128) bf16, cols>=32 are 0

    # ---- per-head attention; O-projection accumulated (no lane concat) ----
    attn = None
    for h in range(N_HEADS):                          # static unrolled, H = 4
        lo = h * D_KV
        qh = qkv[:, lo:lo + D_KV]
        kh = qkv[:, INNER + lo:INNER + lo + D_KV]
        vh = qkv[:, 2 * INNER + lo:2 * INNER + lo + D_KV]
        # q @ k^T without materializing a transpose (NT contraction on the MXU).
        s = lax.dot_general(qh, kh, (((1,), (1,)), ((), ())),
                            preferred_element_type=jnp.float32)   # (S, S) f32
        # relative-position bias (T5 does NOT scale by 1/sqrt(d)); f32 softmax
        s = s + pb_ref[h]
        m = jnp.max(s, axis=-1, keepdims=True)
        p = jnp.exp(s - m)
        inv = pl.reciprocal(jnp.sum(p, axis=-1, keepdims=True), approx=True)
        w = (p * inv).astype(jnp.bfloat16)
        ctx_h = jnp.dot(w, vh, preferred_element_type=jnp.float32)
        contrib = jnp.dot(ctx_h.astype(jnp.bfloat16), wo_all[lo:lo + D_KV, :],
                          preferred_element_type=jnp.float32)     # (S, 128)
        attn = contrib if attn is None else attn + contrib

    h1 = x + attn[:, :D_MODEL]                        # residual; dropout = identity (eval)

    # ---- FF: RMS norm (ln2 folded into Wi) -> Wi -> ReLU -> Wff -> residual ----
    var2 = jnp.mean(h1 * h1, axis=-1, keepdims=True)
    xn2 = (h1 * lax.rsqrt(var2 + EPS)).astype(jnp.bfloat16)
    wi = w_ref[ROW_WI:ROW_WI + D_MODEL, :]            # (32, 128) bf16, cols>=64 are 0
    ff = jnp.dot(xn2, wi, preferred_element_type=jnp.float32)     # (S, 128)
    ff = jnp.maximum(ff, 0.0)[:, :D_FF].astype(jnp.bfloat16)      # (S, D_FF)
    wff = w_ref[ROW_WFF:ROW_WFF + D_FF, :]            # (64, 128) bf16, cols>=32 are 0
    ff_out = jnp.dot(ff, wff, preferred_element_type=jnp.float32)

    out_ref[0] = h1 + ff_out[:, :D_MODEL]


def t5_block_pallas(hidden, pb3, slab):
    """hidden: (B,S,D) f32, pb3: (H,S,S) f32, slab: (160,128) bf16."""
    flops = B * (2 * S * D_MODEL * 3 * INNER            # qkv proj
                 + N_HEADS * 2 * (2 * S * S * D_KV)     # qk^T + attn@v
                 + 2 * S * INNER * D_MODEL               # o proj
                 + 2 * S * D_MODEL * D_FF                # wi
                 + 2 * S * D_FF * D_MODEL)               # wff
    bytes_accessed = (2 * B * S * D_MODEL * 4            # hidden in + out
                      + SLAB_ROWS * SLAB_COLS * 2        # weight slab (bf16)
                      + N_HEADS * S * S * 4)             # position bias
    transcendentals = B * N_HEADS * S * S                # exp in softmax

    return pl.pallas_call(
        t5_block_kernel,
        out_shape=jax.ShapeDtypeStruct((B, S, D_MODEL), jnp.float32),
        grid=(B,),
        in_specs=[
            pl.BlockSpec((1, S, D_MODEL), lambda b: (b, 0, 0)),       # hidden, per batch
            pl.BlockSpec((N_HEADS, S, S), lambda b: (0, 0, 0)),       # bias (resident)
            pl.BlockSpec((SLAB_ROWS, SLAB_COLS), lambda b: (0, 0)),   # weight slab (resident)
        ],
        out_specs=pl.BlockSpec((1, S, D_MODEL), lambda b: (b, 0, 0)),
        compiler_params=pltpu.CompilerParams(dimension_semantics=("parallel",)),
        cost_estimate=pl.CostEstimate(flops=flops,
                                      transcendentals=transcendentals,
                                      bytes_accessed=bytes_accessed),
    )(hidden, pb3, slab)


# --------------- compute_bias (static buckets -> one gather) ---------------
def compute_position_bias(bias_table):
    """bias_table: (NUM_BUCKETS, N_HEADS). Returns (1, H, S, S) fp32, matching
    MyT5Attention.compute_bias for the bidirectional (encoder) case."""
    vals = bias_table[REL_BUCKETS]                    # (S, S, H) gather only
    return jnp.transpose(vals, (2, 0, 1))[None].astype(jnp.float32)


# --------------- one-time parameter transform (fold / pack / cast) ---------------
def prepare_kernel_params(params):
    """Fold LN scales into the following projections, pack all weights into one
    padded bf16 slab, and precompute the relative-position bias. All of this is
    static at inference -> done once, off the per-call path."""
    wqkv = jnp.concatenate([params["wq"], params["wk"], params["wv"]], axis=1)
    wqkv = params["ln1"][:, None] * wqkv              # fold ln1 (RMS scale)
    wi = params["ln2"][:, None] * params["wi"]        # fold ln2 (RMS scale)

    slab = jnp.zeros((SLAB_ROWS, SLAB_COLS), jnp.float32)
    slab = slab.at[ROW_QKV:ROW_QKV + D_MODEL, :3 * INNER].set(wqkv)
    slab = slab.at[ROW_WO:ROW_WO + INNER, :D_MODEL].set(params["wo"])
    slab = slab.at[ROW_WI:ROW_WI + D_MODEL, :D_FF].set(wi)
    slab = slab.at[ROW_WFF:ROW_WFF + D_FF, :D_MODEL].set(params["wff"])
    slab = slab.astype(jnp.bfloat16)

    pos_bias = compute_position_bias(params["rel_bias"])   # (1, H, S, S) f32
    return {"slab": slab, "pos_bias": pos_bias, "pb3": pos_bias[0]}


def my_t5_block(hidden, params, kernel_params=None):
    """Mirrors MyT5Block.forward (encoder, use_cache=False, eval):
    returns (hidden_states, position_bias)."""
    if kernel_params is None:
        kernel_params = prepare_kernel_params(params)
    out = t5_block_pallas(hidden, kernel_params["pb3"], kernel_params["slab"])
    return out, kernel_params["pos_bias"]


# ------------------ pure-JAX fp32 reference for verification ------------------
def ref_block(x, pos_bias, p):
    hi = jax.lax.Precision.HIGHEST

    def rms(v, w):
        var = jnp.mean(v * v, axis=-1, keepdims=True)
        return v * jax.lax.rsqrt(var + EPS) * w

    xn = rms(x, p["ln1"])
    q = jnp.einsum("bsd,de->bse", xn, p["wq"], precision=hi)
    k = jnp.einsum("bsd,de->bse", xn, p["wk"], precision=hi)
    v = jnp.einsum("bsd,de->bse", xn, p["wv"], precision=hi)
    q = q.reshape(B, S, N_HEADS, D_KV).transpose(0, 2, 1, 3)
    k = k.reshape(B, S, N_HEADS, D_KV).transpose(0, 2, 1, 3)
    v = v.reshape(B, S, N_HEADS, D_KV).transpose(0, 2, 1, 3)
    scores = jnp.einsum("bhqd,bhkd->bhqk", q, k, precision=hi) + pos_bias
    w = jax.nn.softmax(scores, axis=-1)
    ctx = jnp.einsum("bhqk,bhkd->bhqd", w, v, precision=hi)
    ctx = ctx.transpose(0, 2, 1, 3).reshape(B, S, INNER)
    attn = jnp.einsum("bse,ed->bsd", ctx, p["wo"], precision=hi)
    h1 = x + attn
    xn2 = rms(h1, p["ln2"])
    ff = jnp.maximum(jnp.einsum("bsd,df->bsf", xn2, p["wi"], precision=hi), 0.0)
    ff = jnp.einsum("bsf,fd->bsd", ff, p["wff"], precision=hi)
    return h1 + ff


# ------------------------------ parameter init ------------------------------
def init_params(key):
    ks = jax.random.split(key, 9)
    scale = 0.05
    return {
        # non-trivial ln scales so the weight-folding path is actually exercised
        "ln1": 1.0 + 0.1 * jax.random.normal(ks[7], (D_MODEL,), jnp.float32),
        "ln2": 1.0 + 0.1 * jax.random.normal(ks[8], (D_MODEL,), jnp.float32),
        "wq": scale * jax.random.normal(ks[0], (D_MODEL, INNER), jnp.float32),
        "wk": scale * jax.random.normal(ks[1], (D_MODEL, INNER), jnp.float32),
        "wv": scale * jax.random.normal(ks[2], (D_MODEL, INNER), jnp.float32),
        "wo": scale * jax.random.normal(ks[3], (INNER, D_MODEL), jnp.float32),
        "wi": scale * jax.random.normal(ks[4], (D_MODEL, D_FF), jnp.float32),
        "wff": scale * jax.random.normal(ks[5], (D_FF, D_MODEL), jnp.float32),
        "rel_bias": scale * jax.random.normal(ks[6], (NUM_BUCKETS, N_HEADS), jnp.float32),
    }


# TODO(synk): decoder-only features (KV cache, cross-attention, fp16 clamp) are
# not exercised by the encoder forward path and are not implemented here.

if __name__ == "__main__":
    key = jax.random.PRNGKey(0)
    kx, kp = jax.random.split(key)
    params = init_params(kp)
    x = jax.random.normal(kx, (B, S, D_MODEL), jnp.float32)

    kernel_params = prepare_kernel_params(params)     # one-time fold/pack/bf16 cast
    out, pos_bias = my_t5_block(x, params, kernel_params)
    out = jax.block_until_ready(out)

    ref = ref_block(x, pos_bias, params)
    # bf16 MXU inputs + approx reciprocal => slightly looser tolerance than pure f32
    np.testing.assert_allclose(np.asarray(out), np.asarray(ref), rtol=2e-2, atol=2e-2)

    print("KERNEL_OK")
</pallas_src>

<mosaic_0001>
module attributes {stable_mosaic.version = 11 : i64} {
  func.func @t5_block_kernel(%arg0: i32, %arg1: memref<1x8x32xf32, #tpu.memory_space<vmem>>, %arg2: memref<4x8x8xf32, #tpu.memory_space<vmem>>, %arg3: memref<160x128xbf16, #tpu.memory_space<vmem>>, %arg4: memref<1x8x32xf32, #tpu.memory_space<vmem>>) attributes {dimension_semantics = [#tpu.dimension_semantics<parallel>], iteration_bounds = array<i64: 2>, scalar_prefetch = 0 : i64, scratch_operands = 0 : i64, tpu.core_type = #tpu.core_type<tc>, window_params = [{transform_indices = @transform_0, window_bounds = array<i64: 1, 8, 32>}, {pipeline_mode = #tpu.pipeline_mode<synchronous>, transform_indices = @transform_1, window_bounds = array<i64: 4, 8, 8>}, {pipeline_mode = #tpu.pipeline_mode<synchronous>, transform_indices = @transform_2, window_bounds = array<i64: 160, 128>}, {transform_indices = @transform_3, window_bounds = array<i64: 1, 8, 32>}]} {
    %c0 = arith.constant 0 : index
    %c0_0 = arith.constant 0 : index
    %c0_1 = arith.constant 0 : index
    %0 = vector.load %arg1[%c0, %c0_0, %c0_1] : memref<1x8x32xf32, #tpu.memory_space<vmem>>, vector<1x8x32xf32>
    %1 = vector.shape_cast %0 : vector<1x8x32xf32> to vector<8x32xf32>
    %2 = arith.mulf %1, %1 : vector<8x32xf32>
    %cst = arith.constant dense<0.000000e+00> : vector<8xf32>
    %3 = vector.multi_reduction <add>, %2, %cst [1] : vector<8x32xf32> to vector<8xf32>
    %4 = vector.shape_cast %3 : vector<8xf32> to vector<8x1xf32>
    %cst_2 = arith.constant 3.200000e+01 : f32
    %5 = vector.broadcast %cst_2 : f32 to vector<8x1xf32>
    %6 = arith.divf %4, %5 : vector<8x1xf32>
    %cst_3 = arith.constant 9.99999997E-7 : f32
    %7 = vector.broadcast %cst_3 : f32 to vector<8x1xf32>
    %8 = arith.addf %6, %7 : vector<8x1xf32>
    %9 = math.rsqrt %8 : vector<8x1xf32>
    %10 = vector.broadcast %9 : vector<8x1xf32> to vector<8x32xf32>
    %11 = arith.mulf %1, %10 : vector<8x32xf32>
    %12 = arith.truncf %11 : vector<8x32xf32> to vector<8x32xbf16>
    %c0_4 = arith.constant 0 : index
    %c0_5 = arith.constant 0 : index
    %13 = vector.load %arg3[%c0_4, %c0_5] : memref<160x128xbf16, #tpu.memory_space<vmem>>, vector<32x128xbf16>
    %cst_6 = arith.constant dense<0.000000e+00> : vector<8x128xf32>
    %14 = tpu.matmul %12, %13, %cst_6 {dimension_numbers = #tpu.dot_dimension_numbers<[1], [0], [0], [1], [0, 0, 1, 1], [], []>} : vector<8x32xbf16>, vector<32x128xbf16>, vector<8x128xf32> -> vector<8x128xf32>
    %15 = arith.truncf %14 : vector<8x128xf32> to vector<8x128xbf16>
    %c32 = arith.constant 32 : index
    %c0_7 = arith.constant 0 : index
    %16 = vector.load %arg3[%c32, %c0_7] : memref<160x128xbf16, #tpu.memory_space<vmem>>, vector<32x128xbf16>
    %17 = vector.extract_strided_slice %15 {offsets = [0, 0], sizes = [8, 8], strides = [1, 1]} : vector<8x128xbf16> to vector<8x8xbf16>
    %18 = vector.extract_strided_slice %15 {offsets = [0, 32], sizes = [8, 8], strides = [1, 1]} : vector<8x128xbf16> to vector<8x8xbf16>
    %19 = vector.extract_strided_slice %15 {offsets = [0, 64], sizes = [8, 8], strides = [1, 1]} : vector<8x128xbf16> to vector<8x8xbf16>
    %cst_8 = arith.constant dense<0.000000e+00> : vector<8x8xf32>
    %20 = tpu.matmul %17, %18, %cst_8 {dimension_numbers = #tpu.dot_dimension_numbers<[1], [1], [0], [0], [0, 0, 1, 0], [], []>} : vector<8x8xbf16>, vector<8x8xbf16>, vector<8x8xf32> -> vector<8x8xf32>
    %c0_9 = arith.constant 0 : index
    %c0_10 = arith.constant 0 : index
    %c0_11 = arith.constant 0 : index
    %21 = vector.load %arg2[%c0_9, %c0_10, %c0_11] : memref<4x8x8xf32, #tpu.memory_space<vmem>>, vector<1x8x8xf32>
    %22 = vector.shape_cast %21 : vector<1x8x8xf32> to vector<8x8xf32>
    %23 = arith.addf %20, %22 : vector<8x8xf32>
    %cst_12 = arith.constant dense<0xFF800000> : vector<8xf32>
    %24 = vector.multi_reduction <maximumf>, %23, %cst_12 [1] : vector<8x8xf32> to vector<8xf32>
    %25 = vector.shape_cast %24 : vector<8xf32> to vector<8x1xf32>
    %26 = vector.broadcast %25 : vector<8x1xf32> to vector<8x8xf32>
    %27 = arith.subf %23, %26 : vector<8x8xf32>
    %28 = math.exp %27 : vector<8x8xf32>
    %cst_13 = arith.constant dense<0.000000e+00> : vector<8xf32>
    %29 = vector.multi_reduction <add>, %28, %cst_13 [1] : vector<8x8xf32> to vector<8xf32>
    %30 = vector.shape_cast %29 : vector<8xf32> to vector<8x1xf32>
    %31 = tpu.reciprocal %30 {approx = true} : vector<8x1xf32> -> vector<8x1xf32>
    %32 = vector.broadcast %31 : vector<8x1xf32> to vector<8x8xf32>
    %33 = arith.mulf %28, %32 : vector<8x8xf32>
    %34 = arith.truncf %33 : vector<8x8xf32> to vector<8x8xbf16>
    %cst_14 = arith.constant dense<0.000000e+00> : vector<8x8xf32>
    %35 = tpu.matmul %34, %19, %cst_14 {dimension_numbers = #tpu.dot_dimension_numbers<[1], [0], [0], [1], [0, 0, 1, 1], [], []>} : vector<8x8xbf16>, vector<8x8xbf16>, vector<8x8xf32> -> vector<8x8xf32>
    %36 = arith.truncf %35 : vector<8x8xf32> to vector<8x8xbf16>
    %37 = vector.extract_strided_slice %16 {offsets = [0, 0], sizes = [8, 128], strides = [1, 1]} : vector<32x128xbf16> to vector<8x128xbf16>
    %cst_15 = arith.constant dense<0.000000e+00> : vector<8x128xf32>
    %38 = tpu.matmul %36, %37, %cst_15 {dimension_numbers = #tpu.dot_dimension_numbers<[1], [0], [0], [1], [0, 0, 1, 1], [], []>} : vector<8x8xbf16>, vector<8x128xbf16>, vector<8x128xf32> -> vector<8x128xf32>
    %39 = vector.extract_strided_slice %15 {offsets = [0, 8], sizes = [8, 8], strides = [1, 1]} : vector<8x128xbf16> to vector<8x8xbf16>
    %40 = vector.extract_strided_slice %15 {offsets = [0, 40], sizes = [8, 8], strides = [1, 1]} : vector<8x128xbf16> to vector<8x8xbf16>
    %41 = vector.extract_strided_slice %15 {offsets = [0, 72], sizes = [8, 8], strides = [1, 1]} : vector<8x128xbf16> to vector<8x8xbf16>
    %cst_16 = arith.constant dense<0.000000e+00> : vector<8x8xf32>
    %42 = tpu.matmul %39, %40, %cst_16 {dimension_numbers = #tpu.dot_dimension_numbers<[1], [1], [0], [0], [0, 0, 1, 0], [], []>} : vector<8x8xbf16>, vector<8x8xbf16>, vector<8x8xf32> -> vector<8x8xf32>
    %c1 = arith.constant 1 : index
    %c0_17 = arith.constant 0 : index
    %c0_18 = arith.constant 0 : index
    %43 = vector.load %arg2[%c1, %c0_17, %c0_18] : memref<4x8x8xf32, #tpu.memory_space<vmem>>, vector<1x8x8xf32>
    %44 = vector.shape_cast %43 : vector<1x8x8xf32> to vector<8x8xf32>
    %45 = arith.addf %42, %44 : vector<8x8xf32>
    %cst_19 = arith.constant dense<0xFF800000> : vector<8xf32>
    %46 = vector.multi_reduction <maximumf>, %45, %cst_19 [1] : vector<8x8xf32> to vector<8xf32>
    %47 = vector.shape_cast %46 : vector<8xf32> to vector<8x1xf32>
    %48 = vector.broadcast %47 : vector<8x1xf32> to vector<8x8xf32>
    %49 = arith.subf %45, %48 : vector<8x8xf32>
    %50 = math.exp %49 : vector<8x8xf32>
    %cst_20 = arith.constant dense<0.000000e+00> : vector<8xf32>
    %51 = vector.multi_reduction <add>, %50, %cst_20 [1] : vector<8x8xf32> to vector<8xf32>
    %52 = vector.shape_cast %51 : vector<8xf32> to vector<8x1xf32>
    %53 = tpu.reciprocal %52 {approx = true} : vector<8x1xf32> -> vector<8x1xf32>
    %54 = vector.broadcast %53 : vector<8x1xf32> to vector<8x8xf32>
    %55 = arith.mulf %50, %54 : vector<8x8xf32>
    %56 = arith.truncf %55 : vector<8x8xf32> to vector<8x8xbf16>
    %cst_21 = arith.constant dense<0.000000e+00> : vector<8x8xf32>
    %57 = tpu.matmul %56, %41, %cst_21 {dimension_numbers = #tpu.dot_dimension_numbers<[1], [0], [0], [1], [0, 0, 1, 1], [], []>} : vector<8x8xbf16>, vector<8x8xbf16>, vector<8x8xf32> -> vector<8x8xf32>
    %58 = arith.truncf %57 : vector<8x8xf32> to vector<8x8xbf16>
    %59 = vector.extract_strided_slice %16 {offsets = [8, 0], sizes = [8, 128], strides = [1, 1]} : vector<32x128xbf16> to vector<8x128xbf16>
    %cst_22 = arith.constant dense<0.000000e+00> : vector<8x128xf32>
    %60 = tpu.matmul %58, %59, %cst_22 {dimension_numbers = #tpu.dot_dimension_numbers<[1], [0], [0], [1], [0, 0, 1, 1], [], []>} : vector<8x8xbf16>, vector<8x128xbf16>, vector<8x128xf32> -> vector<8x128xf32>
    %61 = arith.addf %38, %60 : vector<8x128xf32>
    %62 = vector.extract_strided_slice %15 {offsets = [0, 16], sizes = [8, 8], strides = [1, 1]} : vector<8x128xbf16> to vector<8x8xbf16>
    %63 = vector.extract_strided_slice %15 {offsets = [0, 48], sizes = [8, 8], strides = [1, 1]} : vector<8x128xbf16> to vector<8x8xbf16>
    %64 = vector.extract_strided_slice %15 {offsets = [0, 80], sizes = [8, 8], strides = [1, 1]} : vector<8x128xbf16> to vector<8x8xbf16>
    %cst_23 = arith.constant dense<0.000000e+00> : vector<8x8xf32>
    %65 = tpu.matmul %62, %63, %cst_23 {dimension_numbers = #tpu.dot_dimension_numbers<[1], [1], [0], [0], [0, 0, 1, 0], [], []>} : vector<8x8xbf16>, vector<8x8xbf16>, vector<8x8xf32> -> vector<8x8xf32>
    %c2 = arith.constant 2 : index
    %c0_24 = arith.constant 0 : index
    %c0_25 = arith.constant 0 : index
    %66 = vector.load %arg2[%c2, %c0_24, %c0_25] : memref<4x8x8xf32, #tpu.memory_space<vmem>>, vector<1x8x8xf32>
    %67 = vector.shape_cast %66 : vector<1x8x8xf32> to vector<8x8xf32>
    %68 = arith.addf %65, %67 : vector<8x8xf32>
    %cst_26 = arith.constant dense<0xFF800000> : vector<8xf32>
    %69 = vector.multi_reduction <maximumf>, %68, %cst_26 [1] : vector<8x8xf32> to vector<8xf32>
    %70 = vector.shape_cast %69 : vector<8xf32> to vector<8x1xf32>
    %71 = vector.broadcast %70 : vector<8x1xf32> to vector<8x8xf32>
    %72 = arith.subf %68, %71 : vector<8x8xf32>
    %73 = math.exp %72 : vector<8x8xf32>
    %cst_27 = arith.constant dense<0.000000e+00> : vector<8xf32>
    %74 = vector.multi_reduction <add>, %73, %cst_27 [1] : vector<8x8xf32> to vector<8xf32>
    %75 = vector.shape_cast %74 : vector<8xf32> to vector<8x1xf32>
    %76 = tpu.reciprocal %75 {approx = true} : vector<8x1xf32> -> vector<8x1xf32>
    %77 = vector.broadcast %76 : vector<8x1xf32> to vector<8x8xf32>
    %78 = arith.mulf %73, %77 : vector<8x8xf32>
    %79 = arith.truncf %78 : vector<8x8xf32> to vector<8x8xbf16>
    %cst_28 = arith.constant dense<0.000000e+00> : vector<8x8xf32>
    %80 = tpu.matmul %79, %64, %cst_28 {dimension_numbers = #tpu.dot_dimension_numbers<[1], [0], [0], [1], [0, 0, 1, 1], [], []>} : vector<8x8xbf16>, vector<8x8xbf16>, vector<8x8xf32> -> vector<8x8xf32>
    %81 = arith.truncf %80 : vector<8x8xf32> to vector<8x8xbf16>
    %82 = vector.extract_strided_slice %16 {offsets = [16, 0], sizes = [8, 128], strides = [1, 1]} : vector<32x128xbf16> to vector<8x128xbf16>
    %cst_29 = arith.constant dense<0.000000e+00> : vector<8x128xf32>
    %83 = tpu.matmul %81, %82, %cst_29 {dimension_numbers = #tpu.dot_dimension_numbers<[1], [0], [0], [1], [0, 0, 1, 1], [], []>} : vector<8x8xbf16>, vector<8x128xbf16>, vector<8x128xf32> -> vector<8x128xf32>
    %84 = arith.addf %61, %83 : vector<8x128xf32>
    %85 = vector.extract_strided_slice %15 {offsets = [0, 24], sizes = [8, 8], strides = [1, 1]} : vector<8x128xbf16> to vector<8x8xbf16>
    %86 = vector.extract_strided_slice %15 {offsets = [0, 56], sizes = [8, 8], strides = [1, 1]} : vector<8x128xbf16> to vector<8x8xbf16>
    %87 = vector.extract_strided_slice %15 {offsets = [0, 88], sizes = [8, 8], strides = [1, 1]} : vector<8x128xbf16> to vector<8x8xbf16>
    %cst_30 = arith.constant dense<0.000000e+00> : vector<8x8xf32>
    %88 = tpu.matmul %85, %86, %cst_30 {dimension_numbers = #tpu.dot_dimension_numbers<[1], [1], [0], [0], [0, 0, 1, 0], [], []>} : vector<8x8xbf16>, vector<8x8xbf16>, vector<8x8xf32> -> vector<8x8xf32>
    %c3 = arith.constant 3 : index
    %c0_31 = arith.constant 0 : index
    %c0_32 = arith.constant 0 : index
    %89 = vector.load %arg2[%c3, %c0_31, %c0_32] : memref<4x8x8xf32, #tpu.memory_space<vmem>>, vector<1x8x8xf32>
    %90 = vector.shape_cast %89 : vector<1x8x8xf32> to vector<8x8xf32>
    %91 = arith.addf %88, %90 : vector<8x8xf32>
    %cst_33 = arith.constant dense<0xFF800000> : vector<8xf32>
    %92 = vector.multi_reduction <maximumf>, %91, %cst_33 [1] : vector<8x8xf32> to vector<8xf32>
    %93 = vector.shape_cast %92 : vector<8xf32> to vector<8x1xf32>
    %94 = vector.broadcast %93 : vector<8x1xf32> to vector<8x8xf32>
    %95 = arith.subf %91, %94 : vector<8x8xf32>
    %96 = math.exp %95 : vector<8x8xf32>
    %cst_34 = arith.constant dense<0.000000e+00> : vector<8xf32>
    %97 = vector.multi_reduction <add>, %96, %cst_34 [1] : vector<8x8xf32> to vector<8xf32>
    %98 = vector.shape_cast %97 : vector<8xf32> to vector<8x1xf32>
    %99 = tpu.reciprocal %98 {approx = true} : vector<8x1xf32> -> vector<8x1xf32>
    %100 = vector.broadcast %99 : vector<8x1xf32> to vector<8x8xf32>
    %101 = arith.mulf %96, %100 : vector<8x8xf32>
    %102 = arith.truncf %101 : vector<8x8xf32> to vector<8x8xbf16>
    %cst_35 = arith.constant dense<0.000000e+00> : vector<8x8xf32>
    %103 = tpu.matmul %102, %87, %cst_35 {dimension_numbers = #tpu.dot_dimension_numbers<[1], [0], [0], [1], [0, 0, 1, 1], [], []>} : vector<8x8xbf16>, vector<8x8xbf16>, vector<8x8xf32> -> vector<8x8xf32>
    %104 = arith.truncf %103 : vector<8x8xf32> to vector<8x8xbf16>
    %105 = vector.extract_strided_slice %16 {offsets = [24, 0], sizes = [8, 128], strides = [1, 1]} : vector<32x128xbf16> to vector<8x128xbf16>
    %cst_36 = arith.constant dense<0.000000e+00> : vector<8x128xf32>
    %106 = tpu.matmul %104, %105, %cst_36 {dimension_numbers = #tpu.dot_dimension_numbers<[1], [0], [0], [1], [0, 0, 1, 1], [], []>} : vector<8x8xbf16>, vector<8x128xbf16>, vector<8x128xf32> -> vector<8x128xf32>
    %107 = arith.addf %84, %106 : vector<8x128xf32>
    %108 = vector.extract_strided_slice %107 {offsets = [0, 0], sizes = [8, 32], strides = [1, 1]} : vector<8x128xf32> to vector<8x32xf32>
    %109 = arith.addf %1, %108 : vector<8x32xf32>
    %110 = arith.mulf %109, %109 : vector<8x32xf32>
    %cst_37 = arith.constant dense<0.000000e+00> : vector<8xf32>
    %111 = vector.multi_reduction <add>, %110, %cst_37 [1] : vector<8x32xf32> to vector<8xf32>
    %112 = vector.shape_cast %111 : vector<8xf32> to vector<8x1xf32>
    %cst_38 = arith.constant 3.200000e+01 : f32
    %113 = vector.broadcast %cst_38 : f32 to vector<8x1xf32>
    %114 = arith.divf %112, %113 : vector<8x1xf32>
    %cst_39 = arith.constant 9.99999997E-7 : f32
    %115 = vector.broadcast %cst_39 : f32 to vector<8x1xf32>
    %116 = arith.addf %114, %115 : vector<8x1xf32>
    %117 = math.rsqrt %116 : vector<8x1xf32>
    %118 = vector.broadcast %117 : vector<8x1xf32> to vector<8x32xf32>
    %119 = arith.mulf %109, %118 : vector<8x32xf32>
    %120 = arith.truncf %119 : vector<8x32xf32> to vector<8x32xbf16>
    %c64 = arith.constant 64 : index
    %c0_40 = arith.constant 0 : index
    %121 = vector.load %arg3[%c64, %c0_40] : memref<160x128xbf16, #tpu.memory_space<vmem>>, vector<32x128xbf16>
    %cst_41 = arith.constant dense<0.000000e+00> : vector<8x128xf32>
    %122 = tpu.matmul %120, %121, %cst_41 {dimension_numbers = #tpu.dot_dimension_numbers<[1], [0], [0], [1], [0, 0, 1, 1], [], []>} : vector<8x32xbf16>, vector<32x128xbf16>, vector<8x128xf32> -> vector<8x128xf32>
    %cst_42 = arith.constant 0.000000e+00 : f32
    %123 = vector.broadcast %cst_42 : f32 to vector<8x128xf32>
    %124 = arith.maximumf %122, %123 : vector<8x128xf32>
    %125 = vector.extract_strided_slice %124 {offsets = [0, 0], sizes = [8, 64], strides = [1, 1]} : vector<8x128xf32> to vector<8x64xf32>
    %126 = arith.truncf %125 : vector<8x64xf32> to vector<8x64xbf16>
    %c96 = arith.constant 96 : index
    %c0_43 = arith.constant 0 : index
    %127 = vector.load %arg3[%c96, %c0_43] : memref<160x128xbf16, #tpu.memory_space<vmem>>, vector<64x128xbf16>
    %cst_44 = arith.constant dense<0.000000e+00> : vector<8x128xf32>
    %128 = tpu.matmul %126, %127, %cst_44 {dimension_numbers = #tpu.dot_dimension_numbers<[1], [0], [0], [1], [0, 0, 1, 1], [], []>} : vector<8x64xbf16>, vector<64x128xbf16>, vector<8x128xf32> -> vector<8x128xf32>
    %129 = vector.extract_strided_slice %128 {offsets = [0, 0], sizes = [8, 32], strides = [1, 1]} : vector<8x128xf32> to vector<8x32xf32>
    %130 = arith.addf %109, %129 : vector<8x32xf32>
    %c0_45 = arith.constant 0 : index
    %c0_46 = arith.constant 0 : index
    %c0_47 = arith.constant 0 : index
    %131 = vector.load %arg4[%c0_45, %c0_46, %c0_47] : memref<1x8x32xf32, #tpu.memory_space<vmem>>, vector<1x8x32xf32>
    %132 = vector.shape_cast %131 : vector<1x8x32xf32> to vector<8x32xf32>
    %133 = vector.shape_cast %130 : vector<8x32xf32> to vector<1x8x32xf32>
    tpu.vector_store %arg4[%c0_45, %c0_46, %c0_47], %133 {strides = array<i32>} : memref<1x8x32xf32, #tpu.memory_space<vmem>>, vector<1x8x32xf32>,
    return
  }
  func.func @transform_0(%arg0: i32) -> (i32, i32, i32) {
    %c0_i32 = arith.constant 0 : i32
    %c0_i32_0 = arith.constant 0 : i32
    %c0_i32_1 = arith.constant 0 : i32
    return %arg0, %c0_i32, %c0_i32_0 : i32, i32, i32
  }
  func.func @transform_1(%arg0: i32) -> (i32, i32, i32) {
    %c0_i32 = arith.constant 0 : i32
    %c0_i32_0 = arith.constant 0 : i32
    %c0_i32_1 = arith.constant 0 : i32
    %c0_i32_2 = arith.constant 0 : i32
    return %c0_i32, %c0_i32_0, %c0_i32_1 : i32, i32, i32
  }
  func.func @transform_2(%arg0: i32) -> (i32, i32) {
    %c0_i32 = arith.constant 0 : i32
    %c0_i32_0 = arith.constant 0 : i32
    %c0_i32_1 = arith.constant 0 : i32
    return %c0_i32, %c0_i32_0 : i32, i32
  }
  func.func @transform_3(%arg0: i32) -> (i32, i32, i32) {
    %c0_i32 = arith.constant 0 : i32
    %c0_i32_0 = arith.constant 0 : i32
    %c0_i32_1 = arith.constant 0 : i32
    return %arg0, %c0_i32, %c0_i32_0 : i32, i32, i32
  }
}

</mosaic_0001>

<bundles_post_ra>
// kernel: tpu_custom_call.1
= control target key start
LH: loop header
LB: loop body
LE: loop exit
PB: predicated region body
PF: predicated region fallthrough
CT: control target
= control target key end

     0   :  { %8 = vsyncpa [#allocation3], 0  ;;  %s2010_s0 = inlined_call_operand.hbm [shape: f32[2,8,32], index: 0, kind: input, shape index: {}]   ;;  %s2011_s1 = inlined_call_operand.hbm [shape: f32[4,8,8], index: 1, kind: input, shape index: {}]   ;;  %s2012_s2 = inlined_call_operand.hbm [shape: bf16[160,128], index: 2, kind: input, shape index: {}]   ;;  %s2013_s3 = inlined_call_operand.hbm [shape: f32[2,8,32], index: 3, kind: output, shape index: {}]  }
   0x1   :  { %10 = vsyncpa [#allocation3 + $0x1], 0 }
   0x2   :  { %11 = vsyncpa [#allocation6], 0 }
   0x3   :  { %12 = vsyncpa [#allocation4], 0 }
   0x4   :  { %14 = vsyncpa [#allocation4 + $0x1], 0  ;;  %s1667_s12 = smov 0   ;;  %s1669_s13 = smov 0  }
   0x5   :  { %s1671_s14 = smov 0   ;;  %s1673_s15 = smov 0  }
   0x6 LB: > { %s1688_s16 = sadd.s32 4294967295, %s1624_s15   ;;  %s1182_s17 = sadd.s32 4294967294, %s1624_s15   ;;  %s1624_s15 = sphi %s1673_s15, %s2033_s15   ;;  %s1620_s14 = sphi %s1671_s14, %s2032_s14   ;;  %s1616_s13 = sphi %s1669_s13, %s2031_s13   ;;  %s1612_s12 = sphi %s1667_s12, %s2030_s12  }
   0x7   : > { %p40_p0 = scmp.ne.s32.totalorder %s1616_s13, %s1612_s12  ;;  %p2014_p1 = scmp.eq.s32.totalorder %s1688_s16, 0 }
   0x8   : > { %p112_p3 = scmp.eq.s32.totalorder %s1182_s17, 1  ;;  %p1183_p5 = scmp.ge.s32.totalorder %s1624_s15, 1 }
   0x9   : > { %p1697_p4 = por %p2014_p1, %p40_p0  ;;  %p119_p7 = scmp.lt.s32.totalorder %s1624_s15, 3 }
   0xa   : > { %p1702_p6 = por %p112_p3, %p40_p0  ;;  %s1626_s21 = smov [#allocation5]  }
   0xb   : > { %s2017_s18 = scalar_select %p1697_p4, 1, 0 }
   0xc   : > { %s2018_s19 = scalar_select %p1702_p6, 1, 0 }
   0xd   : > { %p1707_p8 = pnand %p1183_p5, %p119_p7  ;;  %s131_s22 = sshll.u32 %s1626_s21, 4  ;;  %s1711_s22 = int_to_ptr.vmem [resolvable:$true] %s131_s22 }
   0xe   : > { %s1627_s24 = smov [#allocation7]   ;;  %s1468_s28 = scalar_lea.hbm %s2011_s1, 512 }
   0xf   : > { %p1368_p9 = pneg %p1707_p8  ;;  %s144_s25 = sshll.u32 %s1627_s24, 4  ;;  %s1722_s25 = int_to_ptr.vmem [resolvable:$true] %s144_s25 }
  0x10   : > { %p1469_p12 = scmp.ne.s32.totalorder %s2011_s1, %s1468_s28  ;;  %p1475_p5 = scmp.lt.u32.totalorder %s1468_s28, %s2011_s1 }
  0x11   : > { %p1718_p11 = pnand %p1368_p9, %p2014_p1 }
  0x13   : > { %p1470_p13 = pneg %p1718_p11 }
  0x15   : > { %p1471_p0 = pnand %p1470_p13, %p1469_p12 }
  0x17   : > { %p1472_p3 = pneg %p1471_p0 }
  0x19   : > { %p1477_p7 = pnand %p1475_p5, %p1472_p3 }
  0x1b   : > { %1480 = shalt.err (!%p1477_p7)
}
  0x1c   : > { %s1481_s6 = scalar_lea.vmem %s1711_s22, 512  ;;  %p1489_p2 = scmp.lt.s32.totalorder %s1711_s22, %s1711_s22 }
  0x1d   : > { %p1482_p9 = scmp.ne.s32.totalorder %s1711_s22, %s1481_s6  ;;  %p1490_p12 = scmp.lt.s32.totalorder %s1481_s6, %s1481_s6 }
  0x1f   : > { %p1484_p10 = pnand %p1482_p9, %p1470_p13  ;;  %p1491_p0 = por %p1490_p12, %p1489_p2 }
  0x21   : > { %p1485_p1 = pneg %p1484_p10 }
  0x23   : > { %p1492_p6 = pnand %p1491_p0, %p1485_p1 }
  0x25   : > { %1495 = shalt.err (!%p1492_p6)
}
  0x26   : > { %s1628_s7 = smov 128   ;;  %s1629_s8 = smov 8  }
  0x27   : > { %1371 = dma.hbm_to_vmem [thread:$0]  (!%p1718_p11), %s2011_s1, 512, %s1711_s22, [#allocation6], %s1628_s7, %s1628_s7, %s1629_s8  }
  0x28   : > { %s1496_s21 = scalar_lea.hbm %s2012_s2, 1280 }
  0x29   : > { %p1497_p2 = scmp.ne.s32.totalorder %s2012_s2, %s1496_s21  ;;  %p1503_p10 = scmp.lt.u32.totalorder %s1496_s21, %s2012_s2 }
  0x2b   : > { %p1499_p1 = pnand %p1497_p2, %p1470_p13 }
  0x2d   : > { %p1500_p6 = pneg %p1499_p1 }
  0x2f   : > { %p1505_p3 = pnand %p1503_p10, %p1500_p6 }
  0x31   : > { %1508 = shalt.err (!%p1505_p3)
}
  0x32   : > { %s1509_s22 = scalar_lea.vmem %s1722_s25, 1280  ;;  %p1517_p12 = scmp.lt.s32.totalorder %s1722_s25, %s1722_s25 }
  0x33   : > { %p1510_p5 = scmp.ne.s32.totalorder %s1722_s25, %s1509_s22  ;;  %p1518_p0 = scmp.lt.s32.totalorder %s1509_s22, %s1509_s22 }
  0x35   : > { %p1512_p7 = pnand %p1510_p5, %p1470_p13  ;;  %p1519_p2 = por %p1518_p0, %p1517_p12 }
  0x37   : > { %p1513_p9 = pneg %p1512_p7 }
  0x39   : > { %p1520_p1 = pnand %p1519_p2, %p1513_p9 }
  0x3b   : > { %1523 = shalt.err (!%p1520_p1)
}
  0x3c   : > { %s1630_s29 = smov 64   ;;  %s1631_s30 = smov 4  }
  0x3d   : > { %1374 = dma.hbm_to_vmem [thread:$0]  (!%p1718_p11), %s2012_s2, 1280, %s1722_s25, [#allocation6], %s1630_s29, %s1630_s29, %s1631_s30  }
  0x3e   : > { %s1777_s6 = sadd.s32 1, %s1624_s15   ;;  %s27_s8 = sadd.s32 1, %s1620_s14 }
  0x3f   : > { %s24_s7 = ssub.s32 %s1624_s15, %s1777_s6  ;;  %p34_p6 = scmp.ne.s32.totalorder %s1620_s14, %s1616_s13 }
  0x40   : > { %p25_p13 = scmp.eq.s32.totalorder %s24_s7, 0  ;;  %p35_p10 = scmp.eq.s32.totalorder %s1624_s15, 0 }
  0x41   : > { %p2021_p5 = scmp.eq.s32.totalorder %s1688_s16, 1  ;;  %p1385_p9 = scmp.lt.s32.totalorder %s1624_s15, 2 }
  0x42   : > { %s1786_s9 = scalar_select %p25_p13, %s1620_s14, %s27_s8  }
  0x43   : > { %p36_p3 = por %p35_p10, %p34_p6  ;;  %p1790_p7 = por %p2021_p5, %p34_p6 }
  0x44   : > { %s158_s23 = sand.u32 1, %s1620_s14   ;;  %s1188_s25 = sshll.u32 %s1624_s15, 7 }
  0x45   : > { %s2022_s10 = scalar_select %p1790_p7, 1, 0 }
  0x46   : > { %s1187_s11 = sshll.u32 %s158_s23, 3  ;;  %s1800_s24 = scalar_lea.hbm %s2010_s0, %s1188_s25 }
  0x47   : > { %s162_s26 = scalar_lea.vmem [#allocation2], %s1187_s11  ;;  %p1804_p11 = pnand %p1385_p9, %p36_p3 }
  0x48   : > { %s169_s27 = sshll.u32 %s162_s26, 4  ;;  %s159_s22 = scalar_lea.sflag [#allocation3], %s158_s23  ;;  %s1802_s27 = int_to_ptr.vmem [resolvable:$true] %s169_s27 }
  0x49   : > { %s1524_s29 = scalar_lea.hbm %s1800_s24, 128  ;;  %p1526_p0 = pneg %p1804_p11 }
  0x4a   : > { %p1525_p12 = scmp.ne.s32.totalorder %s1800_s24, %s1524_s29  ;;  %s1529_s5 = scalar_lea.hbm %s2010_s0, 256 }
  0x4b   : > { %p1530_p13 = scmp.lt.u32.totalorder %s1800_s24, %s2010_s0  ;;  %p1531_p6 = scmp.lt.u32.totalorder %s1529_s5, %s1524_s29 }
  0x4c   : > { %p1527_p2 = pnand %p1526_p0, %p1525_p12  ;;  %p1533_p3 = scmp.lt.u32.totalorder %s1524_s29, %s1800_s24 }
  0x4d   : > { %p1532_p10 = por %p1531_p6, %p1530_p13 }
  0x4e   : > { %p1528_p1 = pneg %p1527_p2 }
  0x4f   : > { %p1534_p5 = por %p1533_p3, %p1532_p10 }
  0x51   : > { %p1535_p9 = pnand %p1534_p5, %p1528_p1 }
  0x53   : > { %1538 = shalt.err (!%p1535_p9)
}
  0x54   : > { %s1539_s23 = scalar_lea.vmem %s1802_s27, 128  ;;  %s1632_s11 = smov [#allocation2]  }
  0x55   : > { %p1540_p12 = scmp.ne.s32.totalorder %s1802_s27, %s1539_s23  ;;  %s1544_s25 = sshll.u32 %s1632_s11, 4  ;;  %s1545_s25 = int_to_ptr.vmem [resolvable:$false] %s1544_s25 }
  0x56   : > { %s1546_s17 = scalar_lea.vmem %s1545_s25, 256  ;;  %p1547_p4 = scmp.lt.s32.totalorder %s1802_s27, %s1545_s25 }
  0x57   : > { %p1542_p2 = pnand %p1540_p12, %p1526_p0  ;;  %p1548_p13 = scmp.lt.s32.totalorder %s1546_s17, %s1539_s23 }
  0x59   : > { %p1543_p7 = pneg %p1542_p2  ;;  %p1549_p6 = por %p1548_p13, %p1547_p4 }
  0x5b   : > { %p1550_p10 = pnand %p1549_p6, %p1543_p7 }
  0x5d   : > { %1553 = shalt.err (!%p1550_p10)
}
  0x5e   : > { %1378 = dma.hbm_to_vmem [thread:$0]  (!%p1804_p11), %s1800_s24, 128, %s1802_s27, %s159_s22  }
  0x5f   : > { %178 = sbr.rel (%p1707_p8) target bundleno = 3475 (0xd93), region = 32  ;;  %s1836_s21 = sand.u32 (!%p1707_p8), 1, %s1616_s13  }
  0x60   : > { %s1190_s26 = sshll.u32 (!%p1707_p8), %s1836_s21, 3  ;;  %s181_s29 = scalar_lea.sflag (!%p1707_p8), [#allocation3], %s1836_s21 }
  0x61   : > { %s184_s30 = scalar_lea.vmem (!%p1707_p8), [#allocation2], %s1190_s26  ;;  %p2024_p4 = scmp.ne.s32.totalorder (!%p1707_p8), %s2017_s18, 0 }
  0x66   : > { %1599 = dma.done.wait (%p2024_p4), %s181_s29, 128  }
  0x67   : > { %1601 = vsyncadd (%p2024_p4), %s181_s29, 4294967168  ;;  %p2025_p7 = scmp.eq.s32.totalorder %s1688_s16, 0 }
  0x69   : > { %1603 = dma.done.wait (%p2025_p7), [#allocation6], 1792   ;;  %p2026_p8 = pmov %p2025_p7 }
  0x6a   : > { %v1850_v0 = vld [vmem:[%s184_s30] sm:$0xff]  ;;  %vm218_vm0 = vcmask 261120   ;;  %v1440_v3 = vld [vmem:[#allocation7] sm:$0xff]   ;;  %v1633_v4 = vmov 0.0   ;;  %vm1634_vm1 = vmmov 0   ;;  %v1441_v5 = vld [vmem:[#allocation7 + $0x8] sm:$0xff]  }
  0x6b   : > { %1605 = vsyncadd (%p2026_p8), [#allocation6], 4294965504  ;;  %v217_v1 = vmul.f32 %v1850_v0, %v1850_v0  ;;  %1256 = vmatprep.subr.bf16.mxu1 %v1633_v4  ;;  %1260 = vmatprep.mubr.msk.bf16.mxu1 %vm1634_vm1, %v1633_v4  ;;  %s1635_s18 = smov 88   ;;  %s1636_s20 = smov 96   ;;  %vm296_vm2 = vcmask 64512   ;;  %v292_v22 = vld [vmem:[#allocation5] sm:$0xff] }
  0x6c   : > { %1257 = vmatpush3.bf16.msra.mxu1 %v1440_v3  ;;  %1270 = vmatprep.subr.bf16.mxu0 %v1633_v4  ;;  %s1637_s24 = smov 120   ;;  %v406_v29 = vld [vmem:[#allocation5 + $0x8] sm:$0xff]  ;;  %s1638_s27 = smov 56   ;;  %vm360_vm3 = vcmask 1043456   ;;  %v288_v58 = vld [vmem:[#allocation7 + $0x10] sm:$0xf] }
  0x6d   : > { %v219_v2 = vsel %vm218_vm0, %v217_v1, 0.0  ;;  %1258 = vmatprep.subr.bf16.mxu1 %v1633_v4  ;;  %1272 = vmatprep.mubr.msk.bf16.mxu0 %vm1634_vm1, %v1633_v4  ;;  %s1639_s28 = smov 64   ;;  %s1640_s22 = smov 80   ;;  %v568_v59 = vsel %vm360_vm3, %v288_v58, 0  ;;  %v289_v60 = vld [vmem:[#allocation7 + $0x14] sm:$0xf] }
  0x6e   : > { %220 = vadd.xlane.f32.xlu0 %v219_v2  ;;  %s1641_s4 = smov 112   ;;  %v522_v61 = vsel %vm360_vm3, %v289_v60, 0  ;;  %s1642_s5 = smov 72   ;;  %vm1033_vm4 = vcmask 523264  }
  0x6f   : > { %s1643_s7 = smov 104   ;;  %s1644_s8 = smov 48  }
  0x70   : > { %1259 = vmatpush3.bf16.msra.mxu1 %v1441_v5  ;;  %s1645_s23 = smov 40   ;;  %s1218_s11 = sshll.u32 %s1688_s16, 7 }
  0x71   : > { %1264 = vmatprep.subr.bf16.mxu1 %v1633_v4  ;;  %s214_s25 = scalar_lea.vmem [#allocation8], %s1190_s26  ;;  %s1080_s16 = scalar_lea.sflag [#allocation4], %s1836_s21 }
  0x72   : > { %s1093_s17 = sshll.u32 %s214_s25, 4  ;;  %p2027_p0 = scmp.ne.s32.totalorder %s2022_s10, 0  ;;  %s1967_s17 = int_to_ptr.vmem [resolvable:$true] %s1093_s17 }
  0x73   : > { %s1554_s26 = scalar_lea.vmem %s1967_s17, 128 }
  0x74   : > { %p1555_p11 = scmp.ne.s32.totalorder %s1967_s17, %s1554_s26 }
  0x76   : > { %p1556_p1 = pnand %p1555_p11, %p2027_p0 }
  0x78   : > { %p1557_p3 = pneg %p1556_p1 }
  0xfb   : > { %v221_v6 = vpop.xlane.xlu0 %220 }
  0xfc   : > { %v223_v7 = vmul.f32 0.03125, %v221_v6 }
  0xfe   : > { %v224_v8 = vadd.f32 1e-06, %v223_v7 }
 0x100   : > { %1448 = vrsqrt.f32 %v224_v8 }
 0x10a   : > { %v1449_v9 = vpop.eup %1448 }
 0x10b   : > { %v226_v10 = vmul.f32 %v1449_v9, %v1850_v0 }
 0x10d   : > { %v227_v11 = vpack.c.bf16 %v226_v10, %v226_v10 }
 0x10f   : > { %1261 = vmatmul.mubr.msk.bf16.vlgmr.msra.gmra.mrb[0].mxu1 %vm218_vm0, %v227_v11 }
 0x110   : > { %1266 = vmatprep.mubr.msk.bf16.mxu1 %vm1634_vm1, %v1633_v4 }
 0x1e2   : > { %v281_v12 = vpop.f32.mrb[0].mxu1 }
 0x1e3   : > { %v1867_v13 = vpack.c.bf16 %v281_v12, %v281_v12  ;;  %v1262_v14 = vpop.f32.mrb[1].mxu1 }
 0x1e4   : > { %v284_v15 = vpop.f32.mrb[2].mxu1 }
 0x1e5   : > { %409 = vrot.lane.b32.xlu1 %v1867_v13, %s1635_s18  ;;  %294 = vrot.lane.b32.xlu0 %v1867_v13, %s1636_s20  ;;  %v1263_v16 = vpop.f32.mrb[3].mxu1  ;;  %s1965_s18 = scalar_lea.hbm %s2013_s3, %s1218_s11  ;;  %s1646_s20 = smov [#allocation8]  }
 0x1e9   : > { %407 = vrot.lane.b32.xlu1 %v1867_v13, %s1637_s24  ;;  %s1558_s24 = sshll.u32 %s1646_s20, 4  ;;  %s1559_s24 = int_to_ptr.vmem [resolvable:$false] %s1558_s24 }
 0x1ea   : > { %p1561_p5 = scmp.lt.s32.totalorder %s1967_s17, %s1559_s24 }
 0x257   : > { %v295_v17 = vpop.permute.xlu0 %294  ;;  %v410_v19 = vpop.permute.xlu1 %409 }
 0x258   : > { %v301_v18 = vsel %vm296_vm2, %v295_v17, 0  ;;  %v415_v20 = vsel %vm296_vm2, %v410_v19, 0 }
 0x259   : > { %1265 = vmatpush3.bf16.xpose.msra.mxu1 %v301_v18 }
 0x25a   : > { %1276 = vmatprep.subr.bf16.mxu1 %v1633_v4 }
 0x25b   : > { %v408_v21 = vpop.permute.xlu1 %407 }
 0x260   : > { %1267 = vmatmul.mubr.msk.bf16.vlgmr.msra.gmra.mrb[4].mxu1 %vm296_vm2, %v1867_v13 }
 0x261   : > { %1277 = vmatpush3.bf16.xpose.msra.mxu1 %v415_v20  ;;  %1278 = vmatprep.mubr.msk.bf16.mxu1 %vm1634_vm1, %v1633_v4 }
 0x262   : > { %1288 = vmatprep.subr.bf16.mxu1 %v1633_v4 }
 0x268   : > { %1279 = vmatmul.mubr.msk.bf16.vlgmr.msra.gmra.mrb[8].mxu1 %vm296_vm2, %v408_v21 }
 0x269   : > { %1290 = vmatprep.mubr.msk.bf16.mxu1 %vm1634_vm1, %v1633_v4  ;;  %1289 = vmatpush3.bf16.msra.mxu1 %v522_v61 }
 0x26a   : > { %1300 = vmatprep.subr.bf16.mxu1 %v1633_v4 }
 0x333   : > { %v337_v23 = vpop.f32.mrb[4].mxu1 }
 0x334   : > { %v338_v24 = vadd.f32 %v337_v23, %v292_v22  ;;  %v1268_v25 = vpop.f32.mrb[5].mxu1  ;;  %v611_v23 = vld [vmem:[#allocation5 + $0x10] sm:$0xff] }
 0x335   : > { %v340_v26 = vpop.f32.mrb[6].mxu1 }
 0x336   : > { %v1269_v27 = vpop.f32.mrb[7].mxu1  ;;  %v343_v28 = vsel %vm296_vm2, %v338_v24, -inf }
 0x337   : > { %344 = vmax.xlane.f32.xlu1 %v343_v28 }
 0x33b   : > { %v451_v30 = vpop.f32.mrb[8].mxu1 }
 0x33c   : > { %v452_v31 = vadd.f32 %v451_v30, %v406_v29  ;;  %v1280_v32 = vpop.f32.mrb[9].mxu1 }
 0x33d   : > { %v454_v33 = vpop.f32.mrb[10].mxu1 }
 0x33e   : > { %v1281_v34 = vpop.f32.mrb[11].mxu1  ;;  %v457_v35 = vsel %vm296_vm2, %v452_v31, -inf }
 0x33f   : > { %458 = vmax.xlane.f32.xlu0 %v457_v35 }
 0x355   : > { %469 = vrot.lane.b32.xlu0 %v1867_v13, %s1638_s27  ;;  %s1560_s27 = scalar_lea.vmem %s1559_s24, 256 }
 0x356   : > { %p1562_p9 = scmp.lt.s32.totalorder %s1560_s27, %s1554_s26 }
 0x358   : > { %p1563_p12 = por %p1562_p9, %p1561_p5 }
 0x35a   : > { %p1564_p2 = pnand %p1563_p12, %p1557_p3 }
 0x3c4   : > { %v345_v36 = vpop.xlane.xlu1 %344 }
 0x3c5   : > { %v346_v37 = vsub.f32 %v338_v24, %v345_v36 }
 0x3c7   : > { %v347_v38 = vmul.f32 1.442695, %v346_v37 }
 0x3c9   : > { %1450 = vpow2.f32 %v347_v38 }
 0x3cc   : > { %v459_v39 = vpop.xlane.xlu0 %458 }
 0x3cd   : > { %v460_v40 = vsub.f32 %v452_v31, %v459_v39 }
 0x3cf   : > { %v461_v41 = vmul.f32 1.442695, %v460_v40 }
 0x3d0   : > { %v470_v52 = vpop.permute.xlu0 %469 }
 0x3d1   : > { %1452 = vpow2.f32 %v461_v41  ;;  %v475_v54 = vsel %vm360_vm3, %v470_v52, 0 }
 0x3d3   : > { %v1451_v42 = vpop.eup %1450 }
 0x3d4   : > { %v349_v43 = vsel %vm296_vm2, %v1451_v42, 0.0 }
 0x3d5   : > { %350 = vadd.xlane.f32.xlu1 %v349_v43 }
 0x3db   : > { %v1453_v44 = vpop.eup %1452 }
 0x3dc   : > { %v463_v45 = vsel %vm296_vm2, %v1453_v44, 0.0 }
 0x3dd   : > { %464 = vadd.xlane.f32.xlu1 %v463_v45 }
 0x3ee   : > { %355 = vrot.lane.b32.xlu1 %v1867_v13, %s1639_s28 }
 0x3f2   : > { %614 = vrot.lane.b32.xlu1 %v1867_v13, %s1640_s22 }
 0x3f6   : > { %612 = vrot.lane.b32.xlu1 %v1867_v13, %s1641_s4 }
 0x462   : > { %v351_v46 = vpop.xlane.xlu1 %350 }
 0x463   : > { %1454 = vrcp.f32 %v351_v46 }
 0x46a   : > { %v465_v47 = vpop.xlane.xlu1 %464 }
 0x46b   : > { %1456 = vrcp.f32 %v465_v47 }
 0x46d   : > { %v1455_v48 = vpop.eup %1454 }
 0x46e   : > { %v356_v49 = vpop.permute.xlu1 %355  ;;  %v353_v50 = vmul.f32 %v1455_v48, %v1451_v42 }
 0x46f   : > { %v362_v51 = vsel %vm360_vm3, %v356_v49, 0 }
 0x470   : > { %1271 = vmatpush3.bf16.msra.mxu0 %v362_v51  ;;  %v354_v53 = vpack.c.bf16 %v353_v50, %v353_v50  ;;  %v771_v51 = vld [vmem:[#allocation5 + $0x18] sm:$0xff] }
 0x471   : > { %1282 = vmatprep.subr.bf16.mxu0 %v1633_v4 }
 0x472   : > { %v615_v5 = vpop.permute.xlu1 %614 }
 0x473   : > { %1273 = vmatmul.mubr.msk.bf16.vlgmr.msra.gmra.mrb[0].mxu0 %vm296_vm2, %v354_v53  ;;  %v620_v10 = vsel %vm296_vm2, %v615_v5, 0 }
 0x474   : > { %1283 = vmatpush3.bf16.msra.mxu0 %v475_v54  ;;  %1284 = vmatprep.mubr.msk.bf16.mxu0 %vm1634_vm1, %v1633_v4 }
 0x475   : > { %v1457_v55 = vpop.eup %1456  ;;  %1294 = vmatprep.subr.bf16.mxu0 %v1633_v4 }
 0x476   : > { %v467_v56 = vmul.f32 %v1457_v55, %v1453_v44  ;;  %v613_v12 = vpop.permute.xlu1 %612  ;;  %v290_v44 = vld [vmem:[#allocation7 + $0x18] sm:$0xf] }
 0x477   : > { %v727_v45 = vsel %vm360_vm3, %v290_v44, 0 }
 0x478   : > { %v468_v57 = vpack.c.bf16 %v467_v56, %v467_v56 }
 0x47b   : > { %1285 = vmatmul.mubr.msk.bf16.vlgmr.msra.gmra.mrb[4].mxu0 %vm296_vm2, %v468_v57 }
 0x47c   : > { %1296 = vmatprep.mubr.msk.bf16.mxu0 %vm1634_vm1, %v1633_v4  ;;  %1295 = vmatpush3.bf16.msra.mxu0 %v568_v59 }
 0x47d   : > { %1306 = vmatprep.subr.bf16.mxu0 %v1633_v4 }
 0x546   : > { %v398_v62 = vpop.f32.mrb[0].mxu0 }
 0x547   : > { %v404_v63 = vpack.c.bf16 %v398_v62, %v398_v62  ;;  %v1274_v1 = vpop.f32.mrb[1].mxu0 }
 0x548   : > { %v401_v2 = vpop.f32.mrb[2].mxu0 }
 0x549   : > { %v1275_v3 = vpop.f32.mrb[3].mxu0  ;;  %1297 = vmatmul.mubr.msk.bf16.vlgmr.msra.gmra.mrb[8].mxu0 %vm296_vm2, %v404_v63  ;;  %v291_v2 = vld [vmem:[#allocation7 + $0x1c] sm:$0xf] }
 0x54a   : > { %1308 = vmatprep.mubr.msk.bf16.mxu0 %vm1634_vm1, %v1633_v4  ;;  %v887_v3 = vsel %vm360_vm3, %v291_v2, 0 }
 0x54e   : > { %v511_v6 = vpop.f32.mrb[4].mxu0 }
 0x54f   : > { %v517_v7 = vpack.c.bf16 %v511_v6, %v511_v6  ;;  %v1286_v8 = vpop.f32.mrb[5].mxu0 }
 0x550   : > { %v514_v9 = vpop.f32.mrb[6].mxu0 }
 0x551   : > { %v1287_v11 = vpop.f32.mrb[7].mxu0  ;;  %1291 = vmatmul.mubr.msk.bf16.vlgmr.msra.gmra.mrb[12].mxu1 %vm296_vm2, %v517_v7 }
 0x552   : > { %1301 = vmatpush3.bf16.xpose.msra.mxu1 %v620_v10  ;;  %1302 = vmatprep.mubr.msk.bf16.mxu1 %vm1634_vm1, %v1633_v4 }
 0x553   : > { %1312 = vmatprep.subr.bf16.mxu1 %v1633_v4 }
 0x559   : > { %1303 = vmatmul.mubr.msk.bf16.vlgmr.msra.gmra.mrb[16].mxu1 %vm296_vm2, %v613_v12 }
 0x55a   : > { %1314 = vmatprep.mubr.msk.bf16.mxu1 %vm1634_vm1, %v1633_v4  ;;  %1313 = vmatpush3.bf16.msra.mxu1 %v727_v45 }
 0x55b   : > { %1324 = vmatprep.subr.bf16.mxu1 %v1633_v4 }
 0x61c   : > { %v604_v14 = vpop.f32.mrb[8].mxu0 }
 0x61d   : > { %v1298_v15 = vpop.f32.mrb[9].mxu0 }
 0x61e   : > { %v607_v16 = vpop.f32.mrb[10].mxu0 }
 0x61f   : > { %v1299_v17 = vpop.f32.mrb[11].mxu0 }
 0x624   : > { %v558_v18 = vpop.f32.mrb[12].mxu1 }
 0x625   : > { %v1916_v19 = vadd.f32 %v604_v14, %v558_v18  ;;  %v1292_v20 = vpop.f32.mrb[13].mxu1 }
 0x626   : > { %v561_v21 = vpop.f32.mrb[14].mxu1 }
 0x627   : > { %v1293_v22 = vpop.f32.mrb[15].mxu1 }
 0x62c   : > { %v656_v24 = vpop.f32.mrb[16].mxu1 }
 0x62d   : > { %v657_v25 = vadd.f32 %v656_v24, %v611_v23  ;;  %v1304_v26 = vpop.f32.mrb[17].mxu1 }
 0x62e   : > { %v659_v27 = vpop.f32.mrb[18].mxu1 }
 0x62f   : > { %v1305_v28 = vpop.f32.mrb[19].mxu1  ;;  %v662_v29 = vsel %vm296_vm2, %v657_v25, -inf  ;;  %v1442_v27 = vld [vmem:[#allocation7 + $0x20] sm:$0xff]  }
 0x630   : > { %663 = vmax.xlane.f32.xlu1 %v662_v29  ;;  %v1443_v28 = vld [vmem:[#allocation7 + $0x28] sm:$0xff]   ;;  %v1444_v29 = vld [vmem:[#allocation7 + $0x30] sm:$0xff]  }
 0x641   : > { %774 = vrot.lane.b32.xlu1 %v1867_v13, %s1642_s5 }
 0x645   : > { %772 = vrot.lane.b32.xlu1 %v1867_v13, %s1643_s7 }
 0x6bd   : > { %v664_v30 = vpop.xlane.xlu1 %663 }
 0x6be   : > { %v665_v31 = vsub.f32 %v657_v25, %v664_v30  ;;  %v1445_v30 = vld [vmem:[#allocation7 + $0x38] sm:$0xff]  }
 0x6c0   : > { %v666_v32 = vmul.f32 1.442695, %v665_v31  ;;  %v1446_v31 = vld [vmem:[#allocation7 + $0x40] sm:$0xff]  }
 0x6c1   : > { %v775_v40 = vpop.permute.xlu1 %774 }
 0x6c2   : > { %1458 = vpow2.f32 %v666_v32  ;;  %v780_v42 = vsel %vm296_vm2, %v775_v40, 0 }
 0x6c5   : > { %v773_v43 = vpop.permute.xlu1 %772 }
 0x6cc   : > { %v1459_v33 = vpop.eup %1458 }
 0x6cd   : > { %v668_v34 = vsel %vm296_vm2, %v1459_v33, 0.0 }
 0x6ce   : > { %669 = vadd.xlane.f32.xlu0 %v668_v34 }
 0x6e4   : > { %674 = vrot.lane.b32.xlu0 %v1867_v13, %s1644_s8 }
 0x75b   : > { %v670_v35 = vpop.xlane.xlu0 %669 }
 0x75c   : > { %1460 = vrcp.f32 %v670_v35 }
 0x75f   : > { %v675_v36 = vpop.permute.xlu0 %674 }
 0x760   : > { %v680_v37 = vsel %vm360_vm3, %v675_v36, 0 }
 0x761   : > { %1307 = vmatpush3.bf16.msra.mxu0 %v680_v37  ;;  %v1447_v37 = vld [vmem:[#allocation7 + $0x48] sm:$0xff]  }
 0x762   : > { %1318 = vmatprep.subr.bf16.mxu0 %v1633_v4 }
 0x766   : > { %v1461_v38 = vpop.eup %1460 }
 0x767   : > { %v672_v39 = vmul.f32 %v1461_v38, %v1459_v33 }
 0x769   : > { %v673_v41 = vpack.c.bf16 %v672_v39, %v672_v39 }
 0x76b   : > { %1309 = vmatmul.mubr.msk.bf16.vlgmr.msra.gmra.mrb[12].mxu0 %vm296_vm2, %v673_v41 }
 0x76c   : > { %1319 = vmatpush3.bf16.xpose.msra.mxu0 %v780_v42  ;;  %1320 = vmatprep.mubr.msk.bf16.mxu0 %vm1634_vm1, %v1633_v4 }
 0x76d   : > { %1330 = vmatprep.subr.bf16.mxu0 %v1633_v4 }
 0x773   : > { %1321 = vmatmul.mubr.msk.bf16.vlgmr.msra.gmra.mrb[16].mxu0 %vm296_vm2, %v773_v43 }
 0x774   : > { %1332 = vmatprep.mubr.msk.bf16.mxu0 %vm1634_vm1, %v1633_v4  ;;  %1331 = vmatpush3.bf16.msra.mxu0 %v887_v3 }
 0x775   : > { %1344 = vmatprep.subr.bf16.mxu0 %v1633_v4 }
 0x83e   : > { %v716_v46 = vpop.f32.mrb[12].mxu0 }
 0x83f   : > { %v722_v47 = vpack.c.bf16 %v716_v46, %v716_v46  ;;  %v1310_v48 = vpop.f32.mrb[13].mxu0 }
 0x840   : > { %v719_v49 = vpop.f32.mrb[14].mxu0 }
 0x841   : > { %v1311_v50 = vpop.f32.mrb[15].mxu0  ;;  %1315 = vmatmul.mubr.msk.bf16.vlgmr.msra.gmra.mrb[20].mxu1 %vm296_vm2, %v722_v47 }
 0x842   : > { %1326 = vmatprep.mubr.msk.bf16.mxu1 %vm1634_vm1, %v1633_v4 }
 0x846   : > { %v816_v52 = vpop.f32.mrb[16].mxu0 }
 0x847   : > { %v817_v53 = vadd.f32 %v816_v52, %v771_v51  ;;  %v1322_v54 = vpop.f32.mrb[17].mxu0 }
 0x848   : > { %v819_v55 = vpop.f32.mrb[18].mxu0 }
 0x849   : > { %v1323_v56 = vpop.f32.mrb[19].mxu0  ;;  %v822_v57 = vsel %vm296_vm2, %v817_v53, -inf }
 0x84a   : > { %823 = vmax.xlane.f32.xlu0 %v822_v57 }
 0x860   : > { %834 = vrot.lane.b32.xlu0 %v1867_v13, %s1645_s23 }
 0x8d7   : > { %v824_v58 = vpop.xlane.xlu0 %823 }
 0x8d8   : > { %v825_v59 = vsub.f32 %v817_v53, %v824_v58 }
 0x8da   : > { %v826_v60 = vmul.f32 1.442695, %v825_v59 }
 0x8db   : > { %v835_v61 = vpop.permute.xlu0 %834 }
 0x8dc   : > { %1462 = vpow2.f32 %v826_v60  ;;  %v840_v62 = vsel %vm360_vm3, %v835_v61, 0 }
 0x8dd   : > { %1325 = vmatpush3.bf16.msra.mxu1 %v840_v62 }
 0x8de   : > { %1336 = vmatprep.subr.bf16.mxu1 %v1633_v4 }
 0x8e6   : > { %v1463_v63 = vpop.eup %1462 }
 0x8e7   : > { %v828_v1 = vsel %vm296_vm2, %v1463_v63, 0.0 }
 0x8e8   : > { %829 = vadd.xlane.f32.xlu1 %v828_v1 }
 0x914   : > { %v763_v13 = vpop.f32.mrb[20].mxu1 }
 0x915   : > { %v769_v5 = vadd.f32 %v763_v13, %v1916_v19  ;;  %v1316_v6 = vpop.f32.mrb[21].mxu1 }
 0x916   : > { %v766_v7 = vpop.f32.mrb[22].mxu1 }
 0x917   : > { %v1317_v8 = vpop.f32.mrb[23].mxu1 }
 0x975   : > { %v830_v9 = vpop.xlane.xlu1 %829 }
 0x976   : > { %1464 = vrcp.f32 %v830_v9 }
 0x980   : > { %v1465_v10 = vpop.eup %1464 }
 0x981   : > { %v832_v11 = vmul.f32 %v1465_v10, %v1463_v63 }
 0x983   : > { %v833_v12 = vpack.c.bf16 %v832_v11, %v832_v11 }
 0x985   : > { %1327 = vmatmul.mubr.msk.bf16.vlgmr.msra.gmra.mrb[24].mxu1 %vm296_vm2, %v833_v12 }
 0x986   : > { %1340 = vmatprep.mubr.msk.bf16.mxu1 %vm1634_vm1, %v1633_v4  ;;  %1337 = vmatpush3.bf16.msra.mxu1 %v1442_v27 }
 0x987   : > { %1338 = vmatprep.subr.bf16.mxu1 %v1633_v4 }
 0x98a   : > { %1339 = vmatpush3.bf16.msra.mxu1 %v1443_v28 }
 0xa58   : > { %v876_v14 = vpop.f32.mrb[24].mxu1 }
 0xa59   : > { %v882_v15 = vpack.c.bf16 %v876_v14, %v876_v14  ;;  %v1328_v16 = vpop.f32.mrb[25].mxu1 }
 0xa5a   : > { %v879_v17 = vpop.f32.mrb[26].mxu1 }
 0xa5b   : > { %v1329_v18 = vpop.f32.mrb[27].mxu1  ;;  %1333 = vmatmul.mubr.msk.bf16.vlgmr.msra.gmra.mrb[20].mxu0 %vm296_vm2, %v882_v15 }
 0xa5c   : > { %1352 = vmatprep.mubr.msk.bf16.mxu0 %vm1634_vm1, %v1633_v4  ;;  %1345 = vmatpush3.bf16.msra.mxu0 %v1444_v29 }
 0xa5d   : > { %1346 = vmatprep.subr.bf16.mxu0 %v1633_v4 }
 0xa60   : > { %1347 = vmatpush3.bf16.msra.mxu0 %v1445_v30 }
 0xa61   : > { %1348 = vmatprep.subr.bf16.mxu0 %v1633_v4 }
 0xa64   : > { %1349 = vmatpush3.bf16.msra.mxu0 %v1446_v31 }
 0xa65   : > { %1350 = vmatprep.subr.bf16.mxu0 %v1633_v4 }
 0xa68   : > { %1351 = vmatpush3.bf16.msra.mxu0 %v1447_v37 }
 0xb2e   : > { %v923_v19 = vpop.f32.mrb[20].mxu0 }
 0xb2f   : > { %v929_v20 = vadd.f32 %v923_v19, %v769_v5  ;;  %v1334_v21 = vpop.f32.mrb[21].mxu0 }
 0xb30   : > { %v926_v22 = vpop.f32.mrb[22].mxu0 }
 0xb31   : > { %v930_v23 = vadd.f32 %v929_v20, %v1850_v0  ;;  %v1335_v24 = vpop.f32.mrb[23].mxu0 }
 0xb33   : > { %v931_v25 = vmul.f32 %v930_v23, %v930_v23 }
 0xb35   : > { %v932_v26 = vsel %vm218_vm0, %v931_v25, 0.0 }
 0xb36   : > { %933 = vadd.xlane.f32.xlu1 %v932_v26 }
 0xbc3   : > { %v934_v0 = vpop.xlane.xlu1 %933 }
 0xbc4   : > { %v935_v32 = vmul.f32 0.03125, %v934_v0 }
 0xbc6   : > { %v936_v33 = vadd.f32 1e-06, %v935_v32 }
 0xbc8   : > { %1466 = vrsqrt.f32 %v936_v33 }
 0xbd2   : > { %v1467_v34 = vpop.eup %1466 }
 0xbd3   : > { %v938_v35 = vmul.f32 %v1467_v34, %v930_v23 }
 0xbd5   : > { %v939_v36 = vpack.c.bf16 %v938_v35, %v938_v35 }
 0xbd7   : > { %1341 = vmatmul.mubr.msk.bf16.vlgmr.msra.gmra.mrb[28].mxu1 %vm218_vm0, %v939_v36 }
 0xcaa   : > { %v993_v38 = vpop.f32.mrb[28].mxu1 }
 0xcab   : > { %v999_v39 = vmax.f32 %v993_v38, 0.0  ;;  %v1342_v40 = vpop.f32.mrb[29].mxu1 }
 0xcac   : > { %v996_v41 = vpop.f32.mrb[30].mxu1 }
 0xcad   : > { %v1000_v4 = vpack.c.bf16 %v999_v39, %v999_v39  ;;  %v1343_v42 = vpop.f32.mrb[31].mxu1 }
 0xcaf   : > { %1353 = vmatmul.mubr.msk.bf16.vlgmr.msra.gmra.mrb[24].mxu0 %vm1033_vm4, %v1000_v4 }
 0xd82   : > { %v1071_v43 = vpop.f32.mrb[24].mxu0 }
 0xd83   : > { %v1077_v44 = vadd.f32 %v1071_v43, %v930_v23  ;;  %v1354_v45 = vpop.f32.mrb[25].mxu0 }
 0xd84   : > { %v1074_v46 = vpop.f32.mrb[26].mxu0 }
 0xd85   : > { %v1355_v47 = vpop.f32.mrb[27].mxu0  ;;  %1078 = vst.msk [vmem:[%s214_s25] sm:$0xff] %vm218_vm0, %v1077_v44 }
 0xd86   : > { %1567 = shalt.err (!%p1564_p2)
}
 0xd87   : > { %s1568_s21 = scalar_lea.hbm %s1965_s18, 128  ;;  %s1572_s4 = scalar_lea.hbm %s2013_s3, 256 }
 0xd88   : > { %p1569_p13 = scmp.ne.s32.totalorder %s1965_s18, %s1568_s21  ;;  %p1573_p4 = scmp.lt.u32.totalorder %s1965_s18, %s2013_s3 }
 0xd89   : > { %p1574_p7 = scmp.lt.u32.totalorder %s1572_s4, %s1568_s21  ;;  %p1576_p11 = scmp.lt.u32.totalorder %s1568_s21, %s1965_s18 }
 0xd8a   : > { %p1570_p6 = pnand %p1569_p13, %p2027_p0 }
 0xd8b   : > { %p1575_p8 = por %p1574_p7, %p1573_p4 }
 0xd8c   : > { %p1571_p10 = pneg %p1570_p6 }
 0xd8d   : > { %p1577_p1 = por %p1576_p11, %p1575_p8 }
 0xd8f   : > { %p1578_p3 = pnand %p1577_p1, %p1571_p10 }
 0xd91   : > { %1581 = shalt.err (!%p1578_p3)
}
 0xd92   : > { %1366 = dma.vmem_to_hbm [thread:$0]  (%p2027_p0), %s1967_s17, 128, %s1965_s18, %s1080_s16  }
 0xd93 PF: > { %s1105_s8 = sand.u32 1, %s1612_s12   ;;  %p2028_p5 = scmp.ne.s32.totalorder %s2018_s19, 0 }
 0xd94   : > { %p2029_p9 = scmp.ge.s32.totalorder %s1624_s15, 2  ;;  %s1106_s23 = scalar_lea.sflag [#allocation4], %s1105_s8 }
 0xd96   : > { %p1380_p12 = pnand %p2029_p9, %p2028_p5 }
 0xd98   : > { %1607 = dma.done.wait (!%p1380_p12), %s1106_s23, 128  }
 0xd99   : > { %1609 = vsyncadd (!%p1380_p12), %s1106_s23, 4294967168  ;;  %p17_p2 = scmp.ge.s32.totalorder %s1777_s6, 4   ;;  %s2030_s12 = smov %s1616_s13 }
 0xd9a   : > { %s2031_s13 = smov %s1620_s14  ;;  %s2032_s14 = smov %s1786_s9 }
 0xd9b   : > { %s2033_s15 = smov %s1777_s6  ;;  %19 = sbr.rel (!%p17_p2) target bundleno = 6 (0x6), region = 88 }
 0xda2   :  { %1111 = vsyncpa [#allocation3], 1 }
 0xda3   :  { %1113 = vsyncpa [#allocation3 + $0x1], 1 }
 0xda4   :  { %1114 = vsyncpa [#allocation6], 1 }
 0xda5   :  { %1115 = vsyncpa [#allocation4], 1 }
 0xda6   :  { %1117 = vsyncpa [#allocation4 + $0x1], 1 }

</bundles_post_ra>
